<compile_context>
chip_gen: v7x
topology: tpu7x:2x2x1
jax: 0.10.0
libtpu: 0.0.40
codegen_flags: <defaults>
</compile_context>

<pallas_src>
import jax
import jax.numpy as jnp
from jax.experimental import pallas as pl
from jax.experimental.pallas import tpu as pltpu

IN_FEATURES = 10
OUT_FEATURES = 1


def linear_kernel(x_ref, w_ref, b_ref, o_ref):
    # x_ref: (TB, IN) VMEM; w_ref: (OUT=1, IN) VMEM; b_ref: (OUT,) SMEM; o_ref: (TB, 1) VMEM.
    # Upcast to f32 so bf16 inputs also work on v5e (no bf16 VPU there); cast is free filler.
    x = x_ref[...].astype(jnp.float32)          # (TB, IN)
    w = w_ref[...].astype(jnp.float32)          # (1, IN) broadcasts over batch rows
    b = b_ref[0]                                # scalar bias from SMEM
    y = jnp.sum(x * w, axis=-1, keepdims=True) + b   # VPU mul + XLU reduce, no MXU
    o_ref[...] = y.astype(o_ref.dtype)


def linear_pallas(x, weight, bias, *, batch_tile=1024):
    """y = x @ weight.T + bias, matching torch.nn.Linear semantics.

    x:      (B, IN_FEATURES)
    weight: (OUT_FEATURES, IN_FEATURES)   -- native PyTorch layout, no wrapper transpose
    bias:   (OUT_FEATURES,)               -- placed in SMEM inside the kernel
    """
    B = x.shape[0]

    if B % batch_tile != 0 or B // batch_tile <= 1:
        # Small-batch path: single kernel invocation, whole problem in VMEM,
        # no grid and therefore no per-step pipeline overhead.
        return pl.pallas_call(
            linear_kernel,
            out_shape=jax.ShapeDtypeStruct((B, OUT_FEATURES), x.dtype),
            in_specs=[
                pl.BlockSpec(memory_space=pltpu.MemorySpace.VMEM),   # x
                pl.BlockSpec(memory_space=pltpu.MemorySpace.VMEM),   # weight (1, IN)
                pl.BlockSpec(memory_space=pltpu.MemorySpace.SMEM),   # bias scalar
            ],
            out_specs=pl.BlockSpec(memory_space=pltpu.MemorySpace.VMEM),
        )(x, weight, bias)

    # Large-batch path: tile the batch; rows are independent, so the grid axis is
    # "parallel" (shards across both TensorCores on v7x, no-op on v5e/v6e).
    grid = (B // batch_tile,)
    return pl.pallas_call(
        linear_kernel,
        out_shape=jax.ShapeDtypeStruct((B, OUT_FEATURES), x.dtype),
        grid=grid,
        in_specs=[
            pl.BlockSpec((batch_tile, IN_FEATURES), lambda i: (i, 0)),       # x tile
            pl.BlockSpec((OUT_FEATURES, IN_FEATURES), lambda i: (0, 0)),     # weight (resident)
            pl.BlockSpec(memory_space=pltpu.MemorySpace.SMEM),               # bias scalar
        ],
        out_specs=pl.BlockSpec((batch_tile, OUT_FEATURES), lambda i: (i, 0)),
        compiler_params=pltpu.CompilerParams(
            dimension_semantics=("parallel",),
            vmem_limit_bytes=32 << 20,   # budget against v7x's smaller VMEM
        ),
    )(x, weight, bias)


if __name__ == "__main__":
    key = jax.random.PRNGKey(0)
    kx, kw, kb, kx2 = jax.random.split(key, 4)

    # Deterministic parameter init (synthetic; mirrors nn.Linear(10, 1) shapes).
    bound = 1.0 / (IN_FEATURES ** 0.5)
    weight = jax.random.uniform(
        kw, (OUT_FEATURES, IN_FEATURES), dtype=jnp.float32, minval=-bound, maxval=bound
    )
    bias = jax.random.uniform(
        kb, (OUT_FEATURES,), dtype=jnp.float32, minval=-bound, maxval=bound
    )

    # Small-batch path (the shape the module implies).
    batch = 8
    x = jax.random.normal(kx, (batch, IN_FEATURES), dtype=jnp.float32)
    y = linear_pallas(x, weight, bias)
    jax.block_until_ready(y)
    y_ref = x @ weight.T + bias
    assert y.shape == (batch, OUT_FEATURES)
    assert jnp.allclose(y, y_ref, atol=1e-5, rtol=1e-5)

    # Exercise the batch-tiled (gridded, "parallel") path as well.
    big_batch = 2048
    x_big = jax.random.normal(kx2, (big_batch, IN_FEATURES), dtype=jnp.float32)
    y_big = linear_pallas(x_big, weight, bias, batch_tile=1024)
    jax.block_until_ready(y_big)
    y_big_ref = x_big @ weight.T + bias
    assert y_big.shape == (big_batch, OUT_FEATURES)
    assert jnp.allclose(y_big, y_big_ref, atol=1e-5, rtol=1e-5)

    print("KERNEL_OK")
</pallas_src>

<mosaic_0001>
module attributes {stable_mosaic.version = 11 : i64} {
  func.func @linear_kernel(%arg0: memref<8x10xf32, #tpu.memory_space<vmem>>, %arg1: memref<1x10xf32, #tpu.memory_space<vmem>>, %arg2: memref<1xf32, #tpu.memory_space<smem>>, %arg3: memref<8x1xf32, #tpu.memory_space<vmem>>) attributes {dimension_semantics = [], scalar_prefetch = 0 : i64, scratch_operands = 0 : i64, tpu.core_type = #tpu.core_type<tc>} {
    %c0 = arith.constant 0 : index
    %c0_0 = arith.constant 0 : index
    %0 = vector.load %arg0[%c0, %c0_0] : memref<8x10xf32, #tpu.memory_space<vmem>>, vector<8x10xf32>
    %c0_1 = arith.constant 0 : index
    %c0_2 = arith.constant 0 : index
    %1 = vector.load %arg1[%c0_1, %c0_2] : memref<1x10xf32, #tpu.memory_space<vmem>>, vector<1x10xf32>
    %c0_3 = arith.constant 0 : index
    %2 = memref.load %arg2[%c0_3] : memref<1xf32, #tpu.memory_space<smem>>
    %3 = vector.broadcast %1 : vector<1x10xf32> to vector<8x10xf32>
    %4 = arith.mulf %0, %3 : vector<8x10xf32>
    %cst = arith.constant dense<0.000000e+00> : vector<8xf32>
    %5 = vector.multi_reduction <add>, %4, %cst [1] : vector<8x10xf32> to vector<8xf32>
    %6 = vector.shape_cast %5 : vector<8xf32> to vector<8x1xf32>
    %7 = vector.broadcast %2 : f32 to vector<8x1xf32>
    %8 = arith.addf %6, %7 : vector<8x1xf32>
    %c0_4 = arith.constant 0 : index
    %c0_5 = arith.constant 0 : index
    %9 = vector.load %arg3[%c0_4, %c0_5] : memref<8x1xf32, #tpu.memory_space<vmem>>, vector<8x1xf32>
    tpu.vector_store %arg3[%c0_4, %c0_5], %8 {strides = array<i32>} : memref<8x1xf32, #tpu.memory_space<vmem>>, vector<8x1xf32>,
    return
  }
}

</mosaic_0001>

<bundles_post_ra>
// kernel: tpu_custom_call.1
= control target key start
LH: loop header
LB: loop body
LE: loop exit
PB: predicated region body
PF: predicated region fallthrough
CT: control target
= control target key end

     0   :  { %9 = vsyncpa [#allocation4], 0  ;;  %s76_s12 = smov [#allocation3]   ;;  %s118_s0 = inlined_call_operand.hbm [shape: f32[8,10], index: 0, kind: input, shape index: {}]   ;;  %s119_s1 = inlined_call_operand.vmem [shape: f32[1,10], index: 1, kind: input, shape index: {}]   ;;  %s120_s2 = inlined_call_operand.<no memory space> [shape: f32[1], index: 2, kind: input, shape index: {}]   ;;  %s121_s3 = inlined_call_operand.vmem [shape: f32[8,1], index: 3, kind: output, shape index: {}]  }
   0x1   :  { %s16_s13 = sshll.u32 %s76_s12, 4  ;;  %s52_s16 = scalar_lea.hbm %s118_s0, 128  ;;  %s17_s13 = int_to_ptr.vmem [resolvable:$true] %s16_s13 }
   0x2   :  { %p53_p0 = scmp.ne.s32.totalorder %s118_s0, %s52_s16  ;;  %p56_p1 = scmp.lt.u32.totalorder %s52_s16, %s118_s0 }
   0x4   :  { %p58_p2 = pnand %p56_p1, %p53_p0 }
   0x6   :  { %61 = shalt.err (!%p58_p2)
}
   0x7   :  { %s62_s21 = scalar_lea.vmem %s17_s13, 128  ;;  %p67_p4 = scmp.lt.s32.totalorder %s17_s13, %s17_s13 }
   0x8   :  { %p63_p3 = scmp.ne.s32.totalorder %s17_s13, %s62_s21  ;;  %p68_p5 = scmp.lt.s32.totalorder %s62_s21, %s62_s21 }
   0xa   :  { %p69_p6 = por %p68_p5, %p67_p4 }
   0xc   :  { %p70_p7 = pnand %p69_p6, %p63_p3 }
   0xe   :  { %73 = shalt.err (!%p70_p7)
}
   0xf   :  { %19 = dma.hbm_to_vmem [thread:$0]  %s118_s0, 128, %s17_s13, [#allocation4]  }
  0x10   :  { %74 = dma.done.wait [#allocation4], 128  }
  0x11   :  { %75 = vsyncadd [#allocation4], 4294967168  ;;  %v27_v0 = vld [vmem:[#allocation3] sm:$0xff]  ;;  %vm37_vm0 = vcmask 80896   ;;  %v41_v4 = vstv %s120_s2  ;;  %vm43_vm1 = vcmask 7168  }
  0x12   :  { %v50_v1 = vld [vmem:[%s119_s1] ss:$0 sm:$0xff] }
  0x13   :  { %v36_v2 = vmul.f32 %v50_v1, %v27_v0 }
  0x15   :  { %v38_v3 = vsel %vm37_vm0, %v36_v2, 0.0 }
  0x16   :  { %39 = vadd.xlane.f32.xlu0 %v38_v3 }
  0xa3   :  { %v40_v5 = vpop.xlane.xlu0 %39 }
  0xa4   :  { %v42_v6 = vadd.f32 %v41_v4, %v40_v5 }
  0xa6   :  { %44 = vst.msk [vmem:[%s121_s3] sm:$0xff] %vm43_vm1, %v42_v6 }
  0xa7   :  { %49 = vsyncpa [#allocation4], 1 }

</bundles_post_ra>
